<compile_context>
chip_gen: v5e
topology: v5e:2x2
jax: 0.10.0
libtpu: 0.0.40
codegen_flags: <defaults>
</compile_context>

<pallas_src>
import jax
import jax.numpy as jnp
from jax.experimental import pallas as pl
from jax.experimental.pallas import tpu as pltpu

_VMEM_BUDGET = 12 * 1024 * 1024  # conservative: fits v5e's 16 MiB scoped default


def _circulant_matmul_kernel(x_ref, wt_ref, o_ref):
    # One (tm, c_pack) x (c_pack, c_pack) MXU matmul per grid step; f32 accumulate.
    o_ref[...] = jnp.dot(
        x_ref[...], wt_ref[...], preferred_element_type=jnp.float32
    ).astype(o_ref.dtype)


def _circulant_matrix_t(weight):
    # Wt = circulant(weight).T  with  circulant(w)[i, j] = w[(j - i) mod n]
    # => Wt[j, i] = w[(j - i) mod n]
    n = weight.shape[0]
    r = jnp.arange(n)
    idx = (r[:, None] - r[None, :]) % n  # idx[j, i] = (j - i) mod n
    return weight[idx]                   # (C, C)


def _round_up(v, m):
    return ((v + m - 1) // m) * m


def _choose_tm(m_rows, c_pack, itemsize):
    """Row-tile size: biggest power of two that fits VMEM and keeps >=~8 steps."""
    tm = 4096
    # (a) fit double-buffered x/out tiles + resident double-buffered Wt
    while tm > 64 and (4 * tm * c_pack + 2 * c_pack * c_pack) * itemsize > _VMEM_BUDGET:
        tm //= 2
    # (b) keep >= ~8 grid steps for DMA/compute overlap and v7x megacore split,
    #     but never shrink below a 256-row floor (per-step overhead dominates).
    while tm > 256 and pl.cdiv(m_rows, tm) < 8:
        tm //= 2
    return max(8, min(tm, _round_up(m_rows, 8)))


def circulant_forward(x, weight, mask_features=None, compute_dtype=None):
    """Equivalent of Circulant(in_channels, mask_features).forward(x)."""
    if mask_features is not None:
        mask = (jnp.arange(weight.shape[0]) < mask_features).astype(weight.dtype)
        weight = weight * mask

    lead = x.shape[:-1]
    c = x.shape[-1]
    out_dtype = x.dtype
    dtype = out_dtype if compute_dtype is None else jnp.dtype(compute_dtype)
    itemsize = jnp.dtype(dtype).itemsize

    # Parameter setup (glue, plain JAX); single dtype so the in-kernel dot is clean.
    wt = _circulant_matrix_t(weight).astype(dtype)  # (C, C) = circulant(w).T
    x2 = x.reshape(-1, c).astype(dtype)
    m = x2.shape[0]

    # Channel-axis layout: lane-pack small C, keep aligned C as-is, pad odd C.
    if c < 128 and 128 % c == 0:
        g, c_pack = 128 // c, 128            # pack G rows per 128-lane row
    elif c % 128 == 0:
        g, c_pack = 1, c                     # already lane-dense
    else:
        g, c_pack = 1, _round_up(c, 128)     # zero-pad K/N to a lane multiple
    m_rows = pl.cdiv(m, g)

    # Tiny workloads, or Wt too large to keep resident in VMEM: let XLA fuse it.
    # TODO(synk): for very large C, add K/N grid axes with an f32 accumulator and
    # build circulant Wt tiles in-kernel (pltpu.roll) instead of falling back.
    if m_rows <= 256 or 2 * c_pack * c_pack * itemsize > _VMEM_BUDGET:
        out = jnp.dot(x2, wt, preferred_element_type=jnp.float32).astype(out_dtype)
        return out.reshape(*lead, c)

    # Materialize the lane-dense operands.
    if g > 1:
        m_g = m_rows * g
        if m_g != m:                         # tiny tail pad only when needed
            x2 = jnp.zeros((m_g, c), dtype).at[:m].set(x2)
        x_in = x2.reshape(m_rows, c_pack)                  # free, contiguous
        wt_in = jnp.kron(jnp.eye(g, dtype=dtype), wt)      # (128,128) block-diag
    elif c_pack == c:
        x_in, wt_in = x2, wt
    else:
        x_in = jnp.zeros((m, c_pack), dtype).at[:, :c].set(x2)
        wt_in = jnp.zeros((c_pack, c_pack), dtype).at[:c, :c].set(wt)

    tm = _choose_tm(m_rows, c_pack, itemsize)
    grid = (pl.cdiv(m_rows, tm),)            # partial last block handled by Pallas

    out = pl.pallas_call(
        _circulant_matmul_kernel,
        out_shape=jax.ShapeDtypeStruct((m_rows, c_pack), dtype),
        grid=grid,
        in_specs=[
            pl.BlockSpec((tm, c_pack), lambda i: (i, 0)),      # x row tile
            pl.BlockSpec((c_pack, c_pack), lambda i: (0, 0)),  # Wt, resident
        ],
        out_specs=pl.BlockSpec((tm, c_pack), lambda i: (i, 0)),
        compiler_params=pltpu.CompilerParams(
            # Row tiles are independent -> shard across TCs on v7x megacore.
            dimension_semantics=("parallel",),
        ),
        cost_estimate=pl.CostEstimate(
            flops=2 * m_rows * c_pack * c_pack,
            transcendentals=0,
            bytes_accessed=itemsize * (2 * m_rows * c_pack + c_pack * c_pack),
        ),
    )(x_in, wt_in)

    if g > 1:
        out = out.reshape(m_rows * g, c)[:m]   # unpack lanes; drop tail pad if any
    elif c_pack != c:
        out = out[:, :c]
    return out.astype(out_dtype).reshape(*lead, c)


def _reference_forward(x, weight, mask_features=None):
    # Pure-JAX reference mirroring the PyTorch code exactly.
    if mask_features is not None:
        mask = (jnp.arange(weight.shape[0]) < mask_features).astype(weight.dtype)
        weight = weight * mask
    n = weight.shape[0]
    r = jnp.arange(n)
    c_mat = weight[(r[None, :] - r[:, None]) % n]  # C[i, j] = w[(j - i) mod n]
    return x @ c_mat.T


if __name__ == "__main__":
    in_channels = 32

    key = jax.random.PRNGKey(0)
    kx, kw, kx2 = jax.random.split(key, 3)

    # Deterministic init matching nn.Linear(in_channels, 1).weight[0]:
    # uniform(-1/sqrt(in_channels), 1/sqrt(in_channels))
    bound = 1.0 / (in_channels ** 0.5)
    weight = jax.random.uniform(
        kw, (in_channels,), dtype=jnp.float32, minval=-bound, maxval=bound
    )

    # Case 1: moderate batch -> lane-packed Pallas path.
    # m = 4*1088 = 4352 rows -> G=4 packing -> 1088 lane-dense rows ->
    # grid of 5 row tiles at tm=256 (last block partial, masked on store).
    x = jax.random.normal(kx, (4, 1088, in_channels), dtype=jnp.float32)
    out = jax.block_until_ready(circulant_forward(x, weight, mask_features=None))
    ref = _reference_forward(x, weight, mask_features=None)
    assert out.shape == ref.shape
    assert jnp.allclose(out, ref, atol=1e-5, rtol=1e-5)

    # Case 2: tiny batch + mask_features -> XLA fallback path + mask logic.
    x_small = jax.random.normal(kx2, (2, 8, in_channels), dtype=jnp.float32)
    out_small = jax.block_until_ready(
        circulant_forward(x_small, weight, mask_features=20)
    )
    ref_small = _reference_forward(x_small, weight, mask_features=20)
    assert out_small.shape == ref_small.shape
    assert jnp.allclose(out_small, ref_small, atol=1e-5, rtol=1e-5)

    print("KERNEL_OK")
</pallas_src>

<mosaic_0001>
module attributes {stable_mosaic.version = 11 : i64} {
  func.func @_circulant_matmul_kernel(%arg0: i32, %arg1: memref<256x128xf32, #tpu.memory_space<vmem>>, %arg2: memref<128x128xf32, #tpu.memory_space<vmem>>, %arg3: memref<256x128xf32, #tpu.memory_space<vmem>>) attributes {dimension_semantics = [#tpu.dimension_semantics<parallel>], iteration_bounds = array<i64: 5>, scalar_prefetch = 0 : i64, scratch_operands = 0 : i64, tpu.core_type = #tpu.core_type<tc>, window_params = [{transform_indices = @transform_0, window_bounds = array<i64: 256, 128>}, {pipeline_mode = #tpu.pipeline_mode<synchronous>, transform_indices = @transform_1, window_bounds = array<i64: 128, 128>}, {transform_indices = @transform_2, window_bounds = array<i64: 256, 128>}]} {
    %c0 = arith.constant 0 : index
    %c0_0 = arith.constant 0 : index
    %0 = vector.load %arg1[%c0, %c0_0] : memref<256x128xf32, #tpu.memory_space<vmem>>, vector<256x128xf32>
    %c0_1 = arith.constant 0 : index
    %c0_2 = arith.constant 0 : index
    %1 = vector.load %arg2[%c0_1, %c0_2] : memref<128x128xf32, #tpu.memory_space<vmem>>, vector<128x128xf32>
    %cst = arith.constant dense<0.000000e+00> : vector<256x128xf32>
    %2 = tpu.matmul %0, %1, %cst {dimension_numbers = #tpu.dot_dimension_numbers<[1], [0], [0], [1], [0, 0, 1, 1], [], []>} : vector<256x128xf32>, vector<128x128xf32>, vector<256x128xf32> -> vector<256x128xf32>
    %c0_3 = arith.constant 0 : index
    %c0_4 = arith.constant 0 : index
    %3 = vector.load %arg3[%c0_3, %c0_4] : memref<256x128xf32, #tpu.memory_space<vmem>>, vector<256x128xf32>
    tpu.vector_store %arg3[%c0_3, %c0_4], %2 {strides = array<i32>} : memref<256x128xf32, #tpu.memory_space<vmem>>, vector<256x128xf32>,
    return
  }
  func.func @transform_0(%arg0: i32) -> (i32, i32) {
    %c0_i32 = arith.constant 0 : i32
    %c0_i32_0 = arith.constant 0 : i32
    return %arg0, %c0_i32 : i32, i32
  }
  func.func @transform_1(%arg0: i32) -> (i32, i32) {
    %c0_i32 = arith.constant 0 : i32
    %c0_i32_0 = arith.constant 0 : i32
    %c0_i32_1 = arith.constant 0 : i32
    return %c0_i32, %c0_i32_0 : i32, i32
  }
  func.func @transform_2(%arg0: i32) -> (i32, i32) {
    %c0_i32 = arith.constant 0 : i32
    %c0_i32_0 = arith.constant 0 : i32
    return %arg0, %c0_i32 : i32, i32
  }
}

</mosaic_0001>

<bundles_post_ra>
// kernel: tpu_custom_call.1
= control target key start
LH: loop header
LB: loop body
LE: loop exit
PB: predicated region body
PF: predicated region fallthrough
CT: control target
= control target key end

     0   :  { %7 = vsyncpa [#allocation3], 0  ;;  %s1071_s0 = inlined_call_operand.hbm [shape: f32[1088,128], index: 0, kind: input, shape index: {}]   ;;  %s1072_s1 = inlined_call_operand.hbm [shape: f32[128,128], index: 1, kind: input, shape index: {}]   ;;  %s1073_s2 = inlined_call_operand.hbm [shape: f32[1088,128], index: 2, kind: output, shape index: {}]  }
   0x1   :  { %9 = vsyncpa [#allocation3 + $0x1], 0 }
   0x2   :  { %10 = vsyncpa [#allocation6], 0 }
   0x3   :  { %11 = vsyncpa [#allocation4], 0 }
   0x4   :  { %13 = vsyncpa [#allocation4 + $0x1], 0  ;;  %s803_s9 = smov 0   ;;  %s805_s10 = smov 0  }
   0x5   :  { %s807_s11 = smov 0   ;;  %s809_s12 = smov 0  }
   0x6 LB: > { %s824_s13 = sadd.s32 4294967295, %s777_s12   ;;  %s497_s14 = sadd.s32 4294967294, %s777_s12   ;;  %s777_s12 = sphi %s809_s12, %s1088_s12   ;;  %s773_s11 = sphi %s807_s11, %s1087_s11   ;;  %s769_s10 = sphi %s805_s10, %s1086_s10   ;;  %s765_s9 = sphi %s803_s9, %s1085_s9  }
   0x7   : > { %s828_s15 = sadd.s32 1, %s777_s12   ;;  %s26_s16 = sadd.s32 1, %s773_s11 }
   0x8   : > { %s23_s17 = ssub.s32 %s777_s12, %s828_s15  ;;  %p33_p0 = scmp.ne.s32.totalorder %s773_s11, %s769_s10 }
   0x9   : > { %p24_p1 = scmp.eq.s32.totalorder %s23_s17, 0  ;;  %p34_p2 = scmp.eq.s32.totalorder %s777_s12, 0 }
   0xa   : > { %p39_p3 = scmp.ne.s32.totalorder %s769_s10, %s765_s9  ;;  %p1074_p4 = scmp.eq.s32.totalorder %s824_s13, 0 }
   0xb   : > { %s840_s18 = scalar_select %p24_p1, %s773_s11, %s26_s16  }
   0xc   : > { %p842_p5 = por %p34_p2, %p33_p0  ;;  %p848_p6 = por %p1074_p4, %p39_p3 }
   0xd   : > { %p84_p7 = scmp.eq.s32.totalorder %s824_s13, 4  ;;  %p90_p8 = scmp.eq.s32.totalorder %s497_s14, 4 }
   0xe   : > { %p498_p9 = scmp.ge.s32.totalorder %s777_s12, 1  ;;  %p97_p10 = scmp.lt.s32.totalorder %s777_s12, 6 }
   0xf   : > { %p855_p11 = por %p84_p7, %p33_p0  ;;  %p859_p12 = por %p90_p8, %p39_p3 }
  0x10   : > { %p863_p13 = pnand %p498_p9, %p97_p10  ;;  %s108_s26 = sshll.u32 %s1072_s1, 4  ;;  %s109_s26 = int_to_ptr.hbm [resolvable:$true] %s108_s26 }
  0x11   : > { %s1078_s22 = scalar_select %p859_p12, 1, 0 }
  0x12   : > { %p577_p1 = pneg %p863_p13  ;;  %s779_s27 = smov [#allocation5]  }
  0x13   : > { %s110_s28 = sshll.u32 %s779_s27, 4  ;;  %s780_s29 = smov 128   ;;  %s111_s28 = int_to_ptr.vmem [resolvable:$true] %s110_s28 }
  0x14   : > { %p578_p0 = pnand %p577_p1, %p1074_p4  ;;  %s781_s30 = smov 8  }
  0x15   : > { %p500_p2 = scmp.ge.s32.totalorder %s777_s12, 5 }
  0x16   : > { %580 = dma.hbm_to_vmem [thread:$0]  (!%p578_p0), %s109_s26, 2048, %s111_s28, [#allocation6], %s780_s29, %s780_s29, %s781_s30  }
  0x17   : > { %120 = sbr.rel (%p500_p2) target bundleno = 64 (0x40), region = 20 }
  0x1c   : > { %123 = sbr.rel (!%p842_p5) target bundleno = 64 (0x40), region = 24  ;;  %s124_s3 = sand.u32 (%p842_p5), 1, %s773_s11  }
  0x1d   : > { %s502_s4 = sshll.u32 (%p842_p5), %s777_s12, 5  ;;  %s501_s5 = sshll.u32 (%p842_p5), %s124_s3, 8 }
  0x1e   : > { %s130_s6 = ssub.s32 (%p842_p5), 136, %s502_s4  ;;  %s882_s16 = scalar_lea.sflag (%p842_p5), [#allocation3], %s124_s3 }
  0x1f   : > { %p131_p3 = scmp.lt.s32.totalorder (%p842_p5), %s130_s6, 32  ;;  %s128_s17 = scalar_lea.vmem (%p842_p5), [#allocation2], %s501_s5 }
  0x21   : > { %s1090_s6 = smov (!%p131_p3, %s130_s6), 32 }
  0x22   : > { %s503_s7 = sshll.u32 %s1090_s6, 3 }
  0x23   : > { %s134_s8 = ssub.s32 256, %s503_s7 }
  0x24   : > { %s135_s14 = sshll.u32 %s134_s8, 4 }
  0x25   : > { %136 = vsyncadd %s882_s16, %s135_s14  ;;  %p885_p5 = scmp.ne.s32.totalorder %s503_s7, 0  ;;  %s521_s24 = sshll.u32 %s777_s12, 8 }
  0x26   : > { %s139_s27 = scalar_lea.hbm %s1071_s0, %s521_s24  ;;  %s893_s28 = sshll.u32 %s128_s17, 4  ;;  %s144_s28 = int_to_ptr.vmem [resolvable:$true] %s893_s28 }
  0x27   : > { %s141_s29 = sshll.u32 %s139_s27, 4  ;;  %s507_s30 = sshll.u32 %s1090_s6, 7  ;;  %s896_s29 = int_to_ptr.hbm [resolvable:$true] %s141_s29 }
  0x28   : > { %s657_s3 = sshra.s32 %s896_s29, 4  ;;  %s659_s4 = sshrl.u32 %s507_s30, 4  ;;  %s658_s3 = int_to_ptr.hbm [resolvable:$true] %s657_s3 }
  0x29   : > { %s664_s5 = scalar_lea.hbm %s658_s3, %s659_s4  ;;  %s668_s14 = scalar_lea.hbm %s1071_s0, 1088 }
  0x2a   : > { %p665_p7 = scmp.ne.s32.totalorder %s658_s3, %s664_s5  ;;  %p669_p10 = scmp.lt.s32.totalorder %s658_s3, %s1071_s0 }
  0x2b   : > { %p670_p1 = scmp.lt.s32.totalorder %s668_s14, %s664_s5 }
  0x2c   : > { %p666_p8 = pnand %p665_p7, %p885_p5 }
  0x2d   : > { %p671_p0 = por %p670_p1, %p669_p10 }
  0x2e   : > { %p667_p9 = pneg %p666_p8 }
  0x30   : > { %p672_p2 = pnand %p671_p0, %p667_p9 }
  0x32   : > { %675 = shalt.err (!%p672_p2)
}
  0x33   : > { %s676_s25 = sshra.s32 %s144_s28, 4  ;;  %s782_s27 = smov [#allocation2]   ;;  %s677_s25 = int_to_ptr.vmem [resolvable:$true] %s676_s25 }
  0x34   : > { %s683_s26 = scalar_lea.vmem %s677_s25, %s659_s4  ;;  %s687_s7 = scalar_lea.vmem %s782_s27, 512 }
  0x35   : > { %p684_p3 = scmp.ne.s32.totalorder %s677_s25, %s683_s26  ;;  %p689_p4 = scmp.lt.s32.totalorder %s687_s7, %s683_s26 }
  0x37   : > { %p685_p7 = pnand %p684_p3, %p885_p5 }
  0x39   : > { %p686_p8 = pneg %p685_p7 }
  0x3b   : > { %p691_p12 = pnand %p689_p4, %p686_p8 }
  0x3d   : > { %694 = shalt.err (!%p691_p12)
}
  0x3e   : > { %s783_s3 = smov 128   ;;  %s784_s5 = smov 8  }
  0x3f   : > { %149 = dma.hbm_to_vmem [thread:$0]  (%p885_p5), %s896_s29, %s507_s30, %s144_s28, %s882_s16, %s783_s3, %s783_s3, %s784_s5  }
  0x40 PF: > { %155 = sbr.rel (%p863_p13) target bundleno = 326 (0x146), region = 28  ;;  %s925_s4 = sand.u32 (!%p863_p13), 1, %s769_s10  }
  0x41   : > { %s509_s8 = sshll.u32 (!%p863_p13), %s925_s4, 8  ;;  %s158_s14 = scalar_lea.sflag (!%p863_p13), [#allocation3], %s925_s4 }
  0x42   : > { %s931_s17 = scalar_lea.vmem (!%p863_p13), [#allocation2], %s509_s8 }
  0x45   : > { %752 = dma.done.wait (%p848_p6), %s158_s14, 4096  }
  0x46   : > { %754 = vsyncadd (%p848_p6), %s158_s14, 4294963200  ;;  %p1081_p4 = scmp.eq.s32.totalorder %s824_s13, 0 }
  0x48   : > { %756 = dma.done.wait (%p1081_p4), [#allocation6], 2048   ;;  %p1082_p12 = pmov %p1081_p4 }
  0x49   : > { %v245_v0 = vld [vmem:[#allocation5 + $0x78] sm:$0xff]  ;;  %v244_v1 = vld [vmem:[#allocation5 + $0x70] sm:$0xff]  ;;  %v243_v2 = vld [vmem:[#allocation5 + $0x68] sm:$0xff]  ;;  %s975_s20 = scalar_lea.vmem [#allocation7], %s509_s8  ;;  %s392_s23 = scalar_lea.sflag [#allocation4], %s925_s4 }
  0x4a   : > { %758 = vsyncadd (%p1082_p12), [#allocation6], 4294965248  ;;  %524 = vmatpush.msra.mxu2 %v245_v0  ;;  %525 = vmatpush.msra.mxu3 %v245_v0  ;;  %v242_v3 = vld [vmem:[#allocation5 + $0x60] sm:$0xff]  ;;  %v241_v4 = vld [vmem:[#allocation5 + $0x58] sm:$0xff]  ;;  %s513_s6 = sshll.u32 (%p855_p11), %s824_s13, 5 }
  0x4b   : > { %246 = vmatpush.msra.mxu0 %v245_v0  ;;  %523 = vmatpush.msra.mxu1 %v245_v0  ;;  %v240_v5 = vld [vmem:[#allocation5 + $0x50] sm:$0xff]  ;;  %v239_v6 = vld [vmem:[#allocation5 + $0x48] sm:$0xff]  ;;  %v238_v7 = vld [vmem:[#allocation5 + $0x40] sm:$0xff]  ;;  %s400_s16 = ssub.s32 (%p855_p11), 136, %s513_s6 }
  0x4c   : > { %527 = vmatpush.msra.mxu2 %v244_v1  ;;  %528 = vmatpush.msra.mxu3 %v244_v1  ;;  %v237_v8 = vld [vmem:[#allocation5 + $0x38] sm:$0xff]  ;;  %v236_v9 = vld [vmem:[#allocation5 + $0x30] sm:$0xff]  ;;  %v235_v10 = vld [vmem:[#allocation5 + $0x28] sm:$0xff]  ;;  %p401_p6 = scmp.lt.s32.totalorder (%p855_p11), %s400_s16, 32 }
  0x4d   : > { %247 = vmatpush.msra.mxu0 %v244_v1  ;;  %526 = vmatpush.msra.mxu1 %v244_v1  ;;  %v234_v11 = vld [vmem:[#allocation5 + $0x20] sm:$0xff]  ;;  %v233_v12 = vld [vmem:[#allocation5 + $0x18] sm:$0xff]  ;;  %v232_v13 = vld [vmem:[#allocation5 + $0x10] sm:$0xff] }
  0x4e   : > { %530 = vmatpush.msra.mxu2 %v243_v2  ;;  %531 = vmatpush.msra.mxu3 %v243_v2  ;;  %v231_v14 = vld [vmem:[#allocation5 + $0x8] sm:$0xff]  ;;  %v230_v15 = vld [vmem:[#allocation5] sm:$0xff]  ;;  %v216_v24 = vld [vmem:[%s931_s17 + $0x90] sm:$0xff] }
  0x4f   : > { %248 = vmatpush.msra.mxu0 %v243_v2  ;;  %529 = vmatpush.msra.mxu1 %v243_v2  ;;  %v214_v16 = vld [vmem:[%s931_s17 + $0x80] sm:$0xff]  ;;  %v215_v20 = vld [vmem:[%s931_s17 + $0x88] sm:$0xff]  ;;  %v224_v25 = vld [vmem:[%s931_s17 + $0xd0] sm:$0xff] }
  0x50   : > { %533 = vmatpush.msra.mxu2 %v242_v3  ;;  %534 = vmatpush.msra.mxu3 %v242_v3  ;;  %v222_v17 = vld [vmem:[%s931_s17 + $0xc0] sm:$0xff]  ;;  %v223_v21 = vld [vmem:[%s931_s17 + $0xc8] sm:$0xff]  ;;  %v200_v26 = vld [vmem:[%s931_s17 + $0x10] sm:$0xff] }
  0x51   : > { %249 = vmatpush.msra.mxu0 %v242_v3  ;;  %532 = vmatpush.msra.mxu1 %v242_v3  ;;  %v198_v18 = vld [vmem:[%s931_s17] sm:$0xff]  ;;  %v199_v22 = vld [vmem:[%s931_s17 + $0x8] sm:$0xff]  ;;  %v208_v27 = vld [vmem:[%s931_s17 + $0x50] sm:$0xff] }
  0x52   : > { %536 = vmatpush.msra.mxu2 %v241_v4  ;;  %537 = vmatpush.msra.mxu3 %v241_v4  ;;  %v206_v19 = vld [vmem:[%s931_s17 + $0x40] sm:$0xff]  ;;  %v207_v23 = vld [vmem:[%s931_s17 + $0x48] sm:$0xff]  ;;  %v217_v28 = vld [vmem:[%s931_s17 + $0x98] sm:$0xff] }
  0x53   : > { %250 = vmatpush.msra.mxu0 %v241_v4  ;;  %535 = vmatpush.msra.mxu1 %v241_v4  ;;  %v225_v29 = vld [vmem:[%s931_s17 + $0xd8] sm:$0xff]  ;;  %v218_v32 = vld [vmem:[%s931_s17 + $0xa0] sm:$0xff]  ;;  %v219_v36 = vld [vmem:[%s931_s17 + $0xa8] sm:$0xff] }
  0x54   : > { %539 = vmatpush.msra.mxu2 %v240_v5  ;;  %540 = vmatpush.msra.mxu3 %v240_v5  ;;  %v201_v30 = vld [vmem:[%s931_s17 + $0x18] sm:$0xff]  ;;  %v226_v33 = vld [vmem:[%s931_s17 + $0xe0] sm:$0xff]  ;;  %v227_v37 = vld [vmem:[%s931_s17 + $0xe8] sm:$0xff] }
  0x55   : > { %251 = vmatpush.msra.mxu0 %v240_v5  ;;  %538 = vmatpush.msra.mxu1 %v240_v5  ;;  %v209_v31 = vld [vmem:[%s931_s17 + $0x58] sm:$0xff]  ;;  %v202_v34 = vld [vmem:[%s931_s17 + $0x20] sm:$0xff]  ;;  %v203_v38 = vld [vmem:[%s931_s17 + $0x28] sm:$0xff] }
  0x56   : > { %542 = vmatpush.msra.mxu2 %v239_v6  ;;  %543 = vmatpush.msra.mxu3 %v239_v6  ;;  %v210_v35 = vld [vmem:[%s931_s17 + $0x60] sm:$0xff]  ;;  %v211_v39 = vld [vmem:[%s931_s17 + $0x68] sm:$0xff]  ;;  %v220_v40 = vld [vmem:[%s931_s17 + $0xb0] sm:$0xff] }
  0x57   : > { %252 = vmatpush.msra.mxu0 %v239_v6  ;;  %541 = vmatpush.msra.mxu1 %v239_v6  ;;  %v228_v41 = vld [vmem:[%s931_s17 + $0xf0] sm:$0xff]  ;;  %v221_v44 = vld [vmem:[%s931_s17 + $0xb8] sm:$0xff] }
  0x58   : > { %545 = vmatpush.msra.mxu2 %v238_v7  ;;  %546 = vmatpush.msra.mxu3 %v238_v7  ;;  %v204_v42 = vld [vmem:[%s931_s17 + $0x30] sm:$0xff]  ;;  %v229_v45 = vld [vmem:[%s931_s17 + $0xf8] sm:$0xff] }
  0x59   : > { %253 = vmatpush.msra.mxu0 %v238_v7  ;;  %544 = vmatpush.msra.mxu1 %v238_v7  ;;  %v212_v43 = vld [vmem:[%s931_s17 + $0x70] sm:$0xff]  ;;  %v205_v46 = vld [vmem:[%s931_s17 + $0x38] sm:$0xff] }
  0x5a   : > { %548 = vmatpush.msra.mxu2 %v237_v8  ;;  %549 = vmatpush.msra.mxu3 %v237_v8  ;;  %v213_v47 = vld [vmem:[%s931_s17 + $0x78] sm:$0xff] }
  0x5b   : > { %254 = vmatpush.msra.mxu0 %v237_v8  ;;  %547 = vmatpush.msra.mxu1 %v237_v8 }
  0x5c   : > { %551 = vmatpush.msra.mxu2 %v236_v9  ;;  %552 = vmatpush.msra.mxu3 %v236_v9 }
  0x5d   : > { %255 = vmatpush.msra.mxu0 %v236_v9  ;;  %550 = vmatpush.msra.mxu1 %v236_v9 }
  0x5e   : > { %554 = vmatpush.msra.mxu2 %v235_v10  ;;  %555 = vmatpush.msra.mxu3 %v235_v10 }
  0x5f   : > { %256 = vmatpush.msra.mxu0 %v235_v10  ;;  %553 = vmatpush.msra.mxu1 %v235_v10 }
  0x60   : > { %557 = vmatpush.msra.mxu2 %v234_v11  ;;  %558 = vmatpush.msra.mxu3 %v234_v11 }
  0x61   : > { %257 = vmatpush.msra.mxu0 %v234_v11  ;;  %556 = vmatpush.msra.mxu1 %v234_v11 }
  0x62   : > { %560 = vmatpush.msra.mxu2 %v233_v12  ;;  %561 = vmatpush.msra.mxu3 %v233_v12 }
  0x63   : > { %258 = vmatpush.msra.mxu0 %v233_v12  ;;  %559 = vmatpush.msra.mxu1 %v233_v12 }
  0x64   : > { %563 = vmatpush.msra.mxu2 %v232_v13  ;;  %564 = vmatpush.msra.mxu3 %v232_v13 }
  0x65   : > { %259 = vmatpush.msra.mxu0 %v232_v13  ;;  %562 = vmatpush.msra.mxu1 %v232_v13 }
  0x66   : > { %566 = vmatpush.msra.mxu2 %v231_v14  ;;  %567 = vmatpush.msra.mxu3 %v231_v14 }
  0x67   : > { %260 = vmatpush.msra.mxu0 %v231_v14  ;;  %565 = vmatpush.msra.mxu1 %v231_v14 }
  0x68   : > { %569 = vmatpush.msra.mxu2 %v230_v15  ;;  %570 = vmatpush.msra.mxu3 %v230_v15 }
  0x69   : > { %310 = vmatmul.f32.vlgmr.msra.gmra.mxu2 %v214_v16  ;;  %334 = vmatmul.f32.vlgmr.msra.gmra.mxu3 %v222_v17 }
  0x6a   : > { %261 = vmatpush.msra.mxu0 %v230_v15  ;;  %568 = vmatpush.msra.mxu1 %v230_v15 }
  0x6b   : > { %262 = vmatmul.f32.vlgmr.msra.gmra.mxu0 %v198_v18  ;;  %286 = vmatmul.f32.vlgmr.msra.gmra.mxu1 %v206_v19 }
  0x71   : > { %313 = vmatmul.f32.gmra.mxu2 %v215_v20  ;;  %337 = vmatmul.f32.gmra.mxu3 %v223_v21 }
  0x73   : > { %265 = vmatmul.f32.gmra.mxu0 %v199_v22  ;;  %289 = vmatmul.f32.gmra.mxu1 %v207_v23 }
  0x79   : > { %316 = vmatmul.f32.gmra.mxu2 %v216_v24  ;;  %340 = vmatmul.f32.gmra.mxu3 %v224_v25 }
  0x7b   : > { %268 = vmatmul.f32.gmra.mxu0 %v200_v26  ;;  %292 = vmatmul.f32.gmra.mxu1 %v208_v27 }
  0x81   : > { %319 = vmatmul.f32.gmra.mxu2 %v217_v28  ;;  %343 = vmatmul.f32.gmra.mxu3 %v225_v29 }
  0x83   : > { %271 = vmatmul.f32.gmra.mxu0 %v201_v30  ;;  %295 = vmatmul.f32.gmra.mxu1 %v209_v31 }
  0x89   : > { %322 = vmatmul.f32.gmra.mxu2 %v218_v32  ;;  %346 = vmatmul.f32.gmra.mxu3 %v226_v33 }
  0x8b   : > { %274 = vmatmul.f32.gmra.mxu0 %v202_v34  ;;  %298 = vmatmul.f32.gmra.mxu1 %v210_v35 }
  0x91   : > { %325 = vmatmul.f32.gmra.mxu2 %v219_v36  ;;  %349 = vmatmul.f32.gmra.mxu3 %v227_v37 }
  0x93   : > { %277 = vmatmul.f32.gmra.mxu0 %v203_v38  ;;  %301 = vmatmul.f32.gmra.mxu1 %v211_v39 }
  0x99   : > { %328 = vmatmul.f32.gmra.mxu2 %v220_v40  ;;  %352 = vmatmul.f32.gmra.mxu3 %v228_v41 }
  0x9b   : > { %280 = vmatmul.f32.gmra.mxu0 %v204_v42  ;;  %304 = vmatmul.f32.gmra.mxu1 %v212_v43 }
  0xa1   : > { %331 = vmatmul.f32.gmra.mxu2 %v221_v44  ;;  %355 = vmatmul.f32.gmra.mxu3 %v229_v45 }
  0xa3   : > { %283 = vmatmul.f32.gmra.mxu0 %v205_v46  ;;  %307 = vmatmul.f32.gmra.mxu1 %v213_v47 }
  0xe8   : > { %v263_v48 = vpop.f32.mrf.mxu0  ;;  %v287_v49 = vpop.f32.mrf.mxu1 }
  0xe9   : > { %359 = vst [vmem:[%s975_s20] sm:$0xff] %v263_v48 }
  0xea   : > { %367 = vst [vmem:[%s975_s20 + $0x40] sm:$0xff] %v287_v49 }
  0xec   : > { %v311_v50 = vpop.f32.mrf.mxu2  ;;  %v335_v51 = vpop.f32.mrf.mxu3 }
  0xed   : > { %375 = vst [vmem:[%s975_s20 + $0x80] sm:$0xff] %v311_v50 }
  0xee   : > { %383 = vst [vmem:[%s975_s20 + $0xc0] sm:$0xff] %v335_v51 }
  0xf0   : > { %v266_v52 = vpop.f32.mrf.mxu0  ;;  %v290_v53 = vpop.f32.mrf.mxu1 }
  0xf1   : > { %360 = vst [vmem:[%s975_s20 + $0x8] sm:$0xff] %v266_v52 }
  0xf2   : > { %368 = vst [vmem:[%s975_s20 + $0x48] sm:$0xff] %v290_v53 }
  0xf4   : > { %v314_v54 = vpop.f32.mrf.mxu2  ;;  %v338_v55 = vpop.f32.mrf.mxu3 }
  0xf5   : > { %376 = vst [vmem:[%s975_s20 + $0x88] sm:$0xff] %v314_v54 }
  0xf6   : > { %384 = vst [vmem:[%s975_s20 + $0xc8] sm:$0xff] %v338_v55 }
  0xf8   : > { %v269_v56 = vpop.f32.mrf.mxu0  ;;  %v293_v57 = vpop.f32.mrf.mxu1 }
  0xf9   : > { %361 = vst [vmem:[%s975_s20 + $0x10] sm:$0xff] %v269_v56 }
  0xfa   : > { %369 = vst [vmem:[%s975_s20 + $0x50] sm:$0xff] %v293_v57 }
  0xfc   : > { %v317_v58 = vpop.f32.mrf.mxu2  ;;  %v341_v59 = vpop.f32.mrf.mxu3 }
  0xfd   : > { %377 = vst [vmem:[%s975_s20 + $0x90] sm:$0xff] %v317_v58 }
  0xfe   : > { %385 = vst [vmem:[%s975_s20 + $0xd0] sm:$0xff] %v341_v59 }
 0x100   : > { %v272_v60 = vpop.f32.mrf.mxu0  ;;  %v296_v61 = vpop.f32.mrf.mxu1 }
 0x101   : > { %362 = vst [vmem:[%s975_s20 + $0x18] sm:$0xff] %v272_v60 }
 0x102   : > { %370 = vst [vmem:[%s975_s20 + $0x58] sm:$0xff] %v296_v61 }
 0x104   : > { %v320_v62 = vpop.f32.mrf.mxu2  ;;  %v344_v63 = vpop.f32.mrf.mxu3 }
 0x105   : > { %378 = vst [vmem:[%s975_s20 + $0x98] sm:$0xff] %v320_v62 }
 0x106   : > { %386 = vst [vmem:[%s975_s20 + $0xd8] sm:$0xff] %v344_v63 }
 0x108   : > { %v275_v0 = vpop.f32.mrf.mxu0  ;;  %v299_v1 = vpop.f32.mrf.mxu1 }
 0x109   : > { %363 = vst [vmem:[%s975_s20 + $0x20] sm:$0xff] %v275_v0 }
 0x10a   : > { %371 = vst [vmem:[%s975_s20 + $0x60] sm:$0xff] %v299_v1 }
 0x10c   : > { %v323_v2 = vpop.f32.mrf.mxu2  ;;  %v347_v3 = vpop.f32.mrf.mxu3 }
 0x10d   : > { %379 = vst [vmem:[%s975_s20 + $0xa0] sm:$0xff] %v323_v2 }
 0x10e   : > { %387 = vst [vmem:[%s975_s20 + $0xe0] sm:$0xff] %v347_v3 }
 0x110   : > { %v278_v4 = vpop.f32.mrf.mxu0  ;;  %v302_v5 = vpop.f32.mrf.mxu1 }
 0x111   : > { %364 = vst [vmem:[%s975_s20 + $0x28] sm:$0xff] %v278_v4 }
 0x112   : > { %372 = vst [vmem:[%s975_s20 + $0x68] sm:$0xff] %v302_v5 }
 0x114   : > { %v326_v6 = vpop.f32.mrf.mxu2  ;;  %v350_v7 = vpop.f32.mrf.mxu3 }
 0x115   : > { %380 = vst [vmem:[%s975_s20 + $0xa8] sm:$0xff] %v326_v6 }
 0x116   : > { %388 = vst [vmem:[%s975_s20 + $0xe8] sm:$0xff] %v350_v7 }
 0x118   : > { %v281_v8 = vpop.f32.mrf.mxu0  ;;  %v305_v9 = vpop.f32.mrf.mxu1 }
 0x119   : > { %365 = vst [vmem:[%s975_s20 + $0x30] sm:$0xff] %v281_v8 }
 0x11a   : > { %373 = vst [vmem:[%s975_s20 + $0x70] sm:$0xff] %v305_v9 }
 0x11c   : > { %v329_v10 = vpop.f32.mrf.mxu2  ;;  %v353_v11 = vpop.f32.mrf.mxu3 }
 0x11d   : > { %381 = vst [vmem:[%s975_s20 + $0xb0] sm:$0xff] %v329_v10 }
 0x11e   : > { %389 = vst [vmem:[%s975_s20 + $0xf0] sm:$0xff] %v353_v11 }
 0x120   : > { %v284_v12 = vpop.f32.mrf.mxu0  ;;  %v308_v13 = vpop.f32.mrf.mxu1 }
 0x121   : > { %366 = vst [vmem:[%s975_s20 + $0x38] sm:$0xff] %v284_v12 }
 0x122   : > { %374 = vst [vmem:[%s975_s20 + $0x78] sm:$0xff] %v308_v13  ;;  %398 = sbr.rel (!%p855_p11) target bundleno = 326 (0x146), region = 40 }
 0x124   : > { %v332_v14 = vpop.f32.mrf.mxu2  ;;  %v356_v15 = vpop.f32.mrf.mxu3 }
 0x125   : > { %382 = vst [vmem:[%s975_s20 + $0xb8] sm:$0xff] %v332_v14 }
 0x126   : > { %390 = vst [vmem:[%s975_s20 + $0xf8] sm:$0xff] %v356_v15 }
 0x127   : > { %s1092_s16 = smov (!%p401_p6, %s400_s16), 32 }
 0x128   : > { %s514_s19 = sshll.u32 %s1092_s16, 3 }
 0x129   : > { %s404_s28 = ssub.s32 256, %s514_s19 }
 0x12a   : > { %s405_s29 = sshll.u32 %s404_s28, 4 }
 0x12b   : > { %406 = vsyncadd %s392_s23, %s405_s29  ;;  %p1018_p13 = scmp.ne.s32.totalorder %s514_s19, 0  ;;  %s522_s30 = sshll.u32 %s824_s13, 8 }
 0x12c   : > { %s409_s26 = scalar_lea.hbm %s1073_s2, %s522_s30  ;;  %s411_s27 = sshll.u32 %s975_s20, 4  ;;  %s1027_s27 = int_to_ptr.vmem [resolvable:$true] %s411_s27 }
 0x12d   : > { %s413_s7 = sshll.u32 %s409_s26, 4  ;;  %s518_s3 = sshll.u32 %s1092_s16, 7  ;;  %s1029_s7 = int_to_ptr.hbm [resolvable:$true] %s413_s7 }
 0x12e   : > { %s696_s5 = sshra.s32 %s1027_s27, 4  ;;  %s698_s8 = sshrl.u32 %s518_s3, 4  ;;  %s697_s5 = int_to_ptr.vmem [resolvable:$true] %s696_s5 }
 0x12f   : > { %s703_s14 = scalar_lea.vmem %s697_s5, %s698_s8  ;;  %s785_s13 = smov [#allocation7]  }
 0x130   : > { %p704_p11 = scmp.ne.s32.totalorder %s697_s5, %s703_s14  ;;  %s707_s17 = scalar_lea.vmem %s785_s13, 512 }
 0x131   : > { %p709_p10 = scmp.lt.s32.totalorder %s707_s17, %s703_s14 }
 0x132   : > { %p705_p5 = pnand %p704_p11, %p1018_p13 }
 0x134   : > { %p706_p9 = pneg %p705_p5 }
 0x136   : > { %p711_p1 = pnand %p709_p10, %p706_p9 }
 0x138   : > { %714 = shalt.err (!%p711_p1)
}
 0x139   : > { %s715_s20 = sshra.s32 %s1029_s7, 4  ;;  %s726_s29 = scalar_lea.hbm %s1073_s2, 1088  ;;  %s716_s20 = int_to_ptr.hbm [resolvable:$true] %s715_s20 }
 0x13a   : > { %s722_s6 = scalar_lea.hbm %s716_s20, %s698_s8  ;;  %p727_p7 = scmp.lt.s32.totalorder %s716_s20, %s1073_s2 }
 0x13b   : > { %p723_p0 = scmp.ne.s32.totalorder %s716_s20, %s722_s6  ;;  %p728_p8 = scmp.lt.s32.totalorder %s726_s29, %s722_s6 }
 0x13d   : > { %p724_p2 = pnand %p723_p0, %p1018_p13  ;;  %p729_p4 = por %p728_p8, %p727_p7 }
 0x13f   : > { %p725_p3 = pneg %p724_p2 }
 0x141   : > { %p730_p12 = pnand %p729_p4, %p725_p3 }
 0x143   : > { %733 = shalt.err (!%p730_p12)
}
 0x144   : > { %s786_s25 = smov 128   ;;  %s787_s26 = smov 8  }
 0x145   : > { %419 = dma.vmem_to_hbm [thread:$0]  (%p1018_p13), %s1027_s27, %s518_s3, %s1029_s7, %s392_s23, %s786_s25, %s786_s25, %s787_s26  }
 0x146 PF: > { %p587_p6 = scmp.ge.s32.totalorder %s777_s12, 2  ;;  %s428_s5 = sand.u32 1, %s765_s9  }
 0x147   : > { %p1084_p11 = scmp.ne.s32.totalorder %s1078_s22, 0  ;;  %s429_s8 = scalar_lea.sflag [#allocation4], %s428_s5 }
 0x149   : > { %p582_p5 = pnand %p587_p6, %p1084_p11 }
 0x14b   : > { %p583_p9 = pneg %p582_p5 }
 0x14d   : > { %760 = dma.done.wait (%p583_p9), %s429_s8, 4096  }
 0x14e   : > { %762 = vsyncadd (%p583_p9), %s429_s8, 4294963200  ;;  %p16_p10 = scmp.ge.s32.totalorder %s828_s15, 7   ;;  %s1085_s9 = smov %s769_s10 }
 0x14f   : > { %s1086_s10 = smov %s773_s11  ;;  %s1087_s11 = smov %s840_s18 }
 0x150   : > { %s1088_s12 = smov %s828_s15  ;;  %18 = sbr.rel (!%p16_p10) target bundleno = 6 (0x6), region = 77 }
 0x155   :  { %435 = vsyncpa [#allocation3], 1 }
 0x156   :  { %437 = vsyncpa [#allocation3 + $0x1], 1 }
 0x157   :  { %438 = vsyncpa [#allocation6], 1 }
 0x158   :  { %439 = vsyncpa [#allocation4], 1 }
 0x159   :  { %441 = vsyncpa [#allocation4 + $0x1], 1 }

</bundles_post_ra>
